<compile_context>
chip_gen: v5e
topology: v5e:2x2
jax: 0.10.0
libtpu: 0.0.40
codegen_flags: <defaults>
</compile_context>

<pallas_src>
import jax
import jax.numpy as jnp
from jax import lax
from jax.experimental import pallas as pl
from jax.experimental.pallas import tpu as pltpu

BN_EPS = 1e-5


def _vmem_capacity_bytes():
    """Per-TensorCore VMEM capacity; fall back to v7x's 64 MiB (smallest of
    v5e/v6e/v7x) when the query is unavailable."""
    try:
        info = pltpu.get_tpu_info()
        cap = getattr(info, "vmem_capacity_bytes", None)
        if cap:
            return int(min(int(cap), 128 << 20))
    except Exception:
        pass
    return 64 << 20


def _plan_hw_tiling(hw, cin, cout, budget_bytes, max_tile=None):
    """Pick the HW-axis tile from the VMEM budget.

    Returns (thw, hw_pad, n_chunks, inner_tiles).  hw_pad is a multiple of thw;
    when hw_pad > hw the ragged tail is masked in the stats kernel and sliced
    off after the apply pass.  n_chunks splits the HW axis of the stats pass
    into independent ("parallel") trajectories for v7x megacore."""
    # f32 bytes per HW lane: double-buffered x and out blocks plus the
    # in-kernel f32 temporaries (xk in pass 1, y in pass 2).
    bytes_per_lane = 4 * (4 * cin + 3 * cout)
    fixed = 4 * (2 * cout * cin + 4 * cin * cin + 8 * (cin + cout)) + (2 << 20)
    thw_max = (budget_bytes - fixed) // bytes_per_lane
    if max_tile is not None:
        thw_max = min(thw_max, max_tile)
    thw_max = max(128, (thw_max // 128) * 128)

    if hw <= thw_max:
        return hw, hw, 1, 1                       # one full-axis block / sample

    thw, hw_pad = None, hw
    t = thw_max
    while t >= 128:                               # largest 128-multiple divisor
        if hw % t == 0:
            thw = t
            break
        t -= 128
    if thw is None:                               # no divisor: pad + mask tail
        thw = thw_max
        hw_pad = -(-hw // thw) * thw
    m_tiles = hw_pad // thw
    n_chunks = 2 if m_tiles % 2 == 0 else 1       # megacore split of stats pass
    return thw, hw_pad, n_chunks, m_tiles // n_chunks


def _make_stats_kernel(thw, inner_tiles, hw, needs_mask):
    """Pass 1: accumulate shifted Gram (Cin x Cin) + shifted / raw channel sums
    of x for one (chunk, sample) trajectory.  W is never touched here."""

    def kernel(x_ref, gram_ref, ssum_ref, rsum_ref, k_scr):
        m = pl.program_id(2)
        x = x_ref[0].astype(jnp.float32)                       # (Cin, thw)

        if needs_mask:
            start = (pl.program_id(0) * inner_tiles + m) * thw
            lane = lax.broadcasted_iota(jnp.int32, x.shape, 1)
            valid = lane < (hw - start)                        # ragged tail mask

        @pl.when(m == 0)
        def _():
            # Shift K := mean of this trajectory's first tile (shifted-data
            # variance trick; exact value of K does not affect correctness).
            k_scr[...] = jnp.sum(x, axis=1, keepdims=True) * (1.0 / thw)
            gram_ref[...] = jnp.zeros_like(gram_ref)
            ssum_ref[...] = jnp.zeros_like(ssum_ref)
            rsum_ref[...] = jnp.zeros_like(rsum_ref)

        xk = x - k_scr[...]                                    # (Cin, thw)
        if needs_mask:
            xk = jnp.where(valid, xk, 0.0)                     # padded x is 0

        # Single MXU op per tile: Cin x Cin Gram with contraction dim = thw.
        g = lax.dot_general(xk, xk, (((1,), (1,)), ((), ())),
                            preferred_element_type=jnp.float32)
        gram_ref[...] += g[None, None]
        ssum_ref[...] += jnp.sum(xk, axis=1, keepdims=True)[None, None]
        rsum_ref[...] += jnp.sum(x, axis=1, keepdims=True)[None, None]

    return kernel


def _make_apply_kernel(use_relu):
    """Pass 2: recompute the cheap 1x1-conv matmul per tile and apply the
    folded BN scale/shift (+ ReLU) in one fused VPU pass."""

    def kernel(x_ref, w_ref, scale_ref, shift_ref, o_ref):
        # TODO(synk): for tiny Cin/Cout a VPU broadcast-FMA path would avoid
        # the underutilized MXU; kept on the MXU for realistic channel counts.
        y = jnp.dot(w_ref[...], x_ref[0], preferred_element_type=jnp.float32)
        out = y * scale_ref[...] + shift_ref[...]
        if use_relu:
            out = jnp.maximum(out, 0.0)
        o_ref[0] = out.astype(o_ref.dtype)

    return kernel


def conv1x1_bn_relu(x, w, gamma, beta, *, use_relu=True, eps=BN_EPS,
                    out_dtype=None, max_tile=None):
    """Bias-free 1x1 conv + training-mode BatchNorm2d (+ ReLU) on NCHW input."""
    N, Cin, H, W = x.shape
    Cout = w.shape[0]
    HW = H * W
    M = N * HW
    out_dtype = x.dtype if out_dtype is None else out_dtype

    capacity = _vmem_capacity_bytes()
    budget = (capacity * 11) // 20                              # ~55% of VMEM
    thw, hw_pad, n_chunks, inner_tiles = _plan_hw_tiling(
        HW, Cin, Cout, budget, max_tile=max_tile)
    m_tiles = hw_pad // thw
    needs_mask = hw_pad != HW

    # Free view (no data movement): NCHW -> (N, Cin, HW); channels on sublanes,
    # spatial axis on lanes (lane-dense blocks).  Zero-pad the ragged tail only
    # when HW has no usable multiple-of-128 divisor.
    x3 = x.reshape(N, Cin, HW)
    if needs_mask:
        x3 = jnp.pad(x3, ((0, 0), (0, 0), (0, hw_pad - HW)))

    bytes_per_lane = 4 * (4 * Cin + 3 * Cout)
    need = bytes_per_lane * thw + 4 * (2 * Cout * Cin + 4 * Cin * Cin) + (2 << 20)
    vmem_limit = int(min(capacity - (8 << 20), max(2 * need, 32 << 20)))

    # ---- Pass 1: x-only streaming stats (Gram / linearity identity) ---------
    gram, ssum, rsum = pl.pallas_call(
        _make_stats_kernel(thw, inner_tiles, HW, needs_mask),
        out_shape=(jax.ShapeDtypeStruct((n_chunks, N, Cin, Cin), jnp.float32),
                   jax.ShapeDtypeStruct((n_chunks, N, Cin, 1), jnp.float32),
                   jax.ShapeDtypeStruct((n_chunks, N, Cin, 1), jnp.float32)),
        grid=(n_chunks, N, inner_tiles),
        in_specs=[pl.BlockSpec((1, Cin, thw),
                               lambda c, n, m: (n, 0, c * inner_tiles + m))],
        out_specs=(pl.BlockSpec((1, 1, Cin, Cin), lambda c, n, m: (c, n, 0, 0)),
                   pl.BlockSpec((1, 1, Cin, 1), lambda c, n, m: (c, n, 0, 0)),
                   pl.BlockSpec((1, 1, Cin, 1), lambda c, n, m: (c, n, 0, 0))),
        scratch_shapes=[pltpu.VMEM((Cin, 1), jnp.float32)],
        compiler_params=pltpu.CompilerParams(
            dimension_semantics=("parallel", "parallel", "arbitrary"),
            vmem_limit_bytes=vmem_limit),
    )(x3)

    # ---- O(Cin^2) BN fold in plain JAX (chunked parallel-variance combine) --
    per_chunk = inner_tiles * thw
    counts = [min(HW, (c + 1) * per_chunk) - c * per_chunk
              for c in range(n_chunks)]                          # valid pixels
    cnt = jnp.asarray(counts, jnp.float32)[:, None]              # (n_chunks, 1)

    w32 = w.astype(jnp.float32)
    tr = rsum[..., 0]                                            # (C, N, Cin)
    ts = ssum[..., 0]
    mu_p = tr / cnt[..., None]                                   # partial means
    s_within = gram - (ts[..., :, None] * ts[..., None, :]) / cnt[..., None, None]
    mu = jnp.sum(tr, axis=(0, 1)) / M                            # (Cin,)
    d = mu_p - mu
    s_between = jnp.einsum("cn,cni,cnj->ij",
                           jnp.broadcast_to(cnt, (n_chunks, N)), d, d)
    scatter = jnp.sum(s_within, axis=(0, 1)) + s_between         # (Cin, Cin)

    mean_y = w32 @ mu                                            # (Cout,)
    var_y = jnp.maximum(jnp.einsum("ci,ij,cj->c", w32, scatter, w32) / M, 0.0)
    scale = gamma.astype(jnp.float32) * lax.rsqrt(var_y + eps)
    shift = beta.astype(jnp.float32) - mean_y * scale

    # ---- Pass 2: recompute matmul per tile, fused folded BN (+ ReLU) --------
    y3 = pl.pallas_call(
        _make_apply_kernel(use_relu),
        out_shape=jax.ShapeDtypeStruct((N, Cout, hw_pad), out_dtype),
        grid=(N, m_tiles),
        in_specs=[pl.BlockSpec((1, Cin, thw), lambda n, m: (n, 0, m)),
                  pl.BlockSpec((Cout, Cin), lambda n, m: (0, 0)),
                  pl.BlockSpec((Cout, 1), lambda n, m: (0, 0)),
                  pl.BlockSpec((Cout, 1), lambda n, m: (0, 0))],
        out_specs=pl.BlockSpec((1, Cout, thw), lambda n, m: (n, 0, m)),
        compiler_params=pltpu.CompilerParams(
            dimension_semantics=("parallel", "parallel"),
            vmem_limit_bytes=vmem_limit),
    )(x3, w, scale.reshape(Cout, 1), shift.reshape(Cout, 1))

    if needs_mask:
        y3 = y3[:, :, :HW]
    return y3.reshape(N, Cout, H, W)


def selfa_regressor_forward(feat_s, feat_t, w, gamma, beta, *, use_relu=True):
    """SelfA value branch, s_H == t_H case: regressor(feat_s), teacher unchanged."""
    y = conv1x1_bn_relu(feat_s, w, gamma, beta, use_relu=use_relu)
    return y, feat_t


def _reference(x, t, w, gamma, beta, use_relu=True):
    """Pure-JAX reference (bias-free 1x1 conv + train-mode BN + ReLU)."""
    y = jnp.einsum("oc,nchw->nohw", w, x)
    mean = jnp.mean(y, axis=(0, 2, 3), keepdims=True)
    var = jnp.mean((y - mean) ** 2, axis=(0, 2, 3), keepdims=True)
    y = (y - mean) * lax.rsqrt(var + BN_EPS)
    y = gamma[None, :, None, None] * y + beta[None, :, None, None]
    if use_relu:
        y = jnp.maximum(y, 0.0)
    return y, t


if __name__ == "__main__":
    # Student (2,4,16,16), teacher (2,8,16,16) => the s_H == t_H branch.
    N, s_C, s_H, s_W = 2, 4, 16, 16
    t_C = 8

    key = jax.random.PRNGKey(0)
    kx, kt, kw, kg, kb = jax.random.split(key, 5)
    feat_s = jax.random.normal(kx, (N, s_C, s_H, s_W), dtype=jnp.float32)
    feat_t = jax.random.normal(kt, (N, t_C, s_H, s_W), dtype=jnp.float32)

    # 1x1 conv weight (bias=False, as in AAEmbed); BatchNorm2d affine params.
    w = 0.1 * jax.random.normal(kw, (t_C, s_C), dtype=jnp.float32)
    gamma = 1.0 + 0.1 * jax.random.normal(kg, (t_C,), dtype=jnp.float32)
    beta = 0.1 * jax.random.normal(kb, (t_C,), dtype=jnp.float32)

    out, t_out = selfa_regressor_forward(feat_s, feat_t, w, gamma, beta,
                                         use_relu=True)
    jax.block_until_ready(out)
    jax.block_until_ready(t_out)

    ref_out, ref_t = _reference(feat_s, feat_t, w, gamma, beta, True)
    assert out.shape == (N, t_C, s_H, s_W)
    assert jnp.allclose(out, ref_out, atol=1e-4, rtol=1e-4)
    assert jnp.array_equal(t_out, ref_t)

    # Ragged / masked-tail + chunked-stats path: HW=144 (not a multiple of 128)
    # with the tile capped at 128, batch 1, and a mean offset to exercise the
    # shifted-Gram numerics.
    xr = jax.random.normal(kx, (1, s_C, 12, 12), dtype=jnp.float32) + 3.0
    out_r = conv1x1_bn_relu(xr, w, gamma, beta, use_relu=True, max_tile=128)
    jax.block_until_ready(out_r)
    ref_r, _ = _reference(xr, feat_t[:1], w, gamma, beta, True)
    assert out_r.shape == (1, t_C, 12, 12)
    assert jnp.allclose(out_r, ref_r, atol=1e-4, rtol=1e-4)

    print("KERNEL_OK")
</pallas_src>

<mosaic_0001>
module attributes {stable_mosaic.version = 11 : i64} {
  func.func @kernel(%arg0: i32, %arg1: i32, %arg2: i32, %arg3: memref<1x4x256xf32, #tpu.memory_space<vmem>>, %arg4: memref<1x1x4x4xf32, #tpu.memory_space<vmem>>, %arg5: memref<1x1x4x1xf32, #tpu.memory_space<vmem>>, %arg6: memref<1x1x4x1xf32, #tpu.memory_space<vmem>>, %arg7: memref<4x1xf32, #tpu.memory_space<vmem>>) attributes {dimension_semantics = [#tpu.dimension_semantics<parallel>, #tpu.dimension_semantics<parallel>, #tpu.dimension_semantics<arbitrary>], iteration_bounds = array<i64: 1, 2, 1>, scalar_prefetch = 0 : i64, scratch_operands = 1 : i64, tpu.core_type = #tpu.core_type<tc>, window_params = [{transform_indices = @transform_0, window_bounds = array<i64: 1, 4, 256>}, {transform_indices = @transform_1, window_bounds = array<i64: 1, 1, 4, 4>}, {transform_indices = @transform_2, window_bounds = array<i64: 1, 1, 4, 1>}, {transform_indices = @transform_3, window_bounds = array<i64: 1, 1, 4, 1>}]} {
    %c0 = arith.constant 0 : index
    %c0_0 = arith.constant 0 : index
    %c0_1 = arith.constant 0 : index
    %0 = vector.load %arg3[%c0, %c0_0, %c0_1] : memref<1x4x256xf32, #tpu.memory_space<vmem>>, vector<1x4x256xf32>
    %1 = vector.shape_cast %0 : vector<1x4x256xf32> to vector<4x256xf32>
    %c0_i32 = arith.constant 0 : i32
    %2 = arith.cmpi eq, %arg2, %c0_i32 : i32
    %3 = arith.extui %2 : i1 to i32
    %c0_i32_2 = arith.constant 0 : i32
    %4 = arith.cmpi ne, %3, %c0_i32_2 : i32
    scf.if %4 {
      %cst_31 = arith.constant dense<0.000000e+00> : vector<4xf32>
      %25 = vector.multi_reduction <add>, %1, %cst_31 [1] : vector<4x256xf32> to vector<4xf32>
      %26 = vector.shape_cast %25 : vector<4xf32> to vector<4x1xf32>
      %cst_32 = arith.constant 3.906250e-03 : f32
      %27 = vector.broadcast %cst_32 : f32 to vector<4x1xf32>
      %28 = arith.mulf %26, %27 : vector<4x1xf32>
      %c0_33 = arith.constant 0 : index
      %c0_34 = arith.constant 0 : index
      %29 = vector.load %arg7[%c0_33, %c0_34] : memref<4x1xf32, #tpu.memory_space<vmem>>, vector<4x1xf32>
      tpu.vector_store %arg7[%c0_33, %c0_34], %28 {strides = array<i32>} : memref<4x1xf32, #tpu.memory_space<vmem>>, vector<4x1xf32>,
      %cst_35 = arith.constant 0.000000e+00 : f32
      %30 = vector.broadcast %cst_35 : f32 to vector<1x1x4x4xf32>
      %c0_36 = arith.constant 0 : index
      %c0_37 = arith.constant 0 : index
      %c0_38 = arith.constant 0 : index
      %c0_39 = arith.constant 0 : index
      %31 = vector.load %arg4[%c0_36, %c0_37, %c0_38, %c0_39] : memref<1x1x4x4xf32, #tpu.memory_space<vmem>>, vector<1x1x4x4xf32>
      tpu.vector_store %arg4[%c0_36, %c0_37, %c0_38, %c0_39], %30 {strides = array<i32>} : memref<1x1x4x4xf32, #tpu.memory_space<vmem>>, vector<1x1x4x4xf32>,
      %cst_40 = arith.constant 0.000000e+00 : f32
      %32 = vector.broadcast %cst_40 : f32 to vector<1x1x4x1xf32>
      %c0_41 = arith.constant 0 : index
      %c0_42 = arith.constant 0 : index
      %c0_43 = arith.constant 0 : index
      %c0_44 = arith.constant 0 : index
      %33 = vector.load %arg5[%c0_41, %c0_42, %c0_43, %c0_44] : memref<1x1x4x1xf32, #tpu.memory_space<vmem>>, vector<1x1x4x1xf32>
      tpu.vector_store %arg5[%c0_41, %c0_42, %c0_43, %c0_44], %32 {strides = array<i32>} : memref<1x1x4x1xf32, #tpu.memory_space<vmem>>, vector<1x1x4x1xf32>,
      %cst_45 = arith.constant 0.000000e+00 : f32
      %34 = vector.broadcast %cst_45 : f32 to vector<1x1x4x1xf32>
      %c0_46 = arith.constant 0 : index
      %c0_47 = arith.constant 0 : index
      %c0_48 = arith.constant 0 : index
      %c0_49 = arith.constant 0 : index
      %35 = vector.load %arg6[%c0_46, %c0_47, %c0_48, %c0_49] : memref<1x1x4x1xf32, #tpu.memory_space<vmem>>, vector<1x1x4x1xf32>
      tpu.vector_store %arg6[%c0_46, %c0_47, %c0_48, %c0_49], %34 {strides = array<i32>} : memref<1x1x4x1xf32, #tpu.memory_space<vmem>>, vector<1x1x4x1xf32>,
    } else {
    }
    %c0_3 = arith.constant 0 : index
    %c0_4 = arith.constant 0 : index
    %5 = vector.load %arg7[%c0_3, %c0_4] : memref<4x1xf32, #tpu.memory_space<vmem>>, vector<4x1xf32>
    %6 = vector.broadcast %5 : vector<4x1xf32> to vector<4x256xf32>
    %7 = arith.subf %1, %6 : vector<4x256xf32>
    %cst = arith.constant dense<0.000000e+00> : vector<4x4xf32>
    %8 = tpu.matmul %7, %7, %cst {dimension_numbers = #tpu.dot_dimension_numbers<[1], [1], [0], [0], [0, 0, 1, 0], [], []>} : vector<4x256xf32>, vector<4x256xf32>, vector<4x4xf32> -> vector<4x4xf32>
    %c0_5 = arith.constant 0 : index
    %c0_6 = arith.constant 0 : index
    %c0_7 = arith.constant 0 : index
    %c0_8 = arith.constant 0 : index
    %9 = vector.load %arg4[%c0_5, %c0_6, %c0_7, %c0_8] : memref<1x1x4x4xf32, #tpu.memory_space<vmem>>, vector<1x1x4x4xf32>
    %10 = vector.shape_cast %8 : vector<4x4xf32> to vector<1x1x4x4xf32>
    %11 = arith.addf %9, %10 : vector<1x1x4x4xf32>
    %c0_9 = arith.constant 0 : index
    %c0_10 = arith.constant 0 : index
    %c0_11 = arith.constant 0 : index
    %c0_12 = arith.constant 0 : index
    %12 = vector.load %arg4[%c0_9, %c0_10, %c0_11, %c0_12] : memref<1x1x4x4xf32, #tpu.memory_space<vmem>>, vector<1x1x4x4xf32>
    tpu.vector_store %arg4[%c0_9, %c0_10, %c0_11, %c0_12], %11 {strides = array<i32>} : memref<1x1x4x4xf32, #tpu.memory_space<vmem>>, vector<1x1x4x4xf32>,
    %c0_13 = arith.constant 0 : index
    %c0_14 = arith.constant 0 : index
    %c0_15 = arith.constant 0 : index
    %c0_16 = arith.constant 0 : index
    %13 = vector.load %arg5[%c0_13, %c0_14, %c0_15, %c0_16] : memref<1x1x4x1xf32, #tpu.memory_space<vmem>>, vector<1x1x4x1xf32>
    %cst_17 = arith.constant dense<0.000000e+00> : vector<4xf32>
    %14 = vector.multi_reduction <add>, %7, %cst_17 [1] : vector<4x256xf32> to vector<4xf32>
    %15 = vector.shape_cast %14 : vector<4xf32> to vector<4x1xf32>
    %16 = vector.shape_cast %15 : vector<4x1xf32> to vector<1x1x4x1xf32>
    %17 = arith.addf %13, %16 : vector<1x1x4x1xf32>
    %c0_18 = arith.constant 0 : index
    %c0_19 = arith.constant 0 : index
    %c0_20 = arith.constant 0 : index
    %c0_21 = arith.constant 0 : index
    %18 = vector.load %arg5[%c0_18, %c0_19, %c0_20, %c0_21] : memref<1x1x4x1xf32, #tpu.memory_space<vmem>>, vector<1x1x4x1xf32>
    tpu.vector_store %arg5[%c0_18, %c0_19, %c0_20, %c0_21], %17 {strides = array<i32>} : memref<1x1x4x1xf32, #tpu.memory_space<vmem>>, vector<1x1x4x1xf32>,
    %c0_22 = arith.constant 0 : index
    %c0_23 = arith.constant 0 : index
    %c0_24 = arith.constant 0 : index
    %c0_25 = arith.constant 0 : index
    %19 = vector.load %arg6[%c0_22, %c0_23, %c0_24, %c0_25] : memref<1x1x4x1xf32, #tpu.memory_space<vmem>>, vector<1x1x4x1xf32>
    %cst_26 = arith.constant dense<0.000000e+00> : vector<4xf32>
    %20 = vector.multi_reduction <add>, %1, %cst_26 [1] : vector<4x256xf32> to vector<4xf32>
    %21 = vector.shape_cast %20 : vector<4xf32> to vector<4x1xf32>
    %22 = vector.shape_cast %21 : vector<4x1xf32> to vector<1x1x4x1xf32>
    %23 = arith.addf %19, %22 : vector<1x1x4x1xf32>
    %c0_27 = arith.constant 0 : index
    %c0_28 = arith.constant 0 : index
    %c0_29 = arith.constant 0 : index
    %c0_30 = arith.constant 0 : index
    %24 = vector.load %arg6[%c0_27, %c0_28, %c0_29, %c0_30] : memref<1x1x4x1xf32, #tpu.memory_space<vmem>>, vector<1x1x4x1xf32>
    tpu.vector_store %arg6[%c0_27, %c0_28, %c0_29, %c0_30], %23 {strides = array<i32>} : memref<1x1x4x1xf32, #tpu.memory_space<vmem>>, vector<1x1x4x1xf32>,
    return
  }
  func.func @transform_0(%arg0: i32, %arg1: i32, %arg2: i32) -> (i32, i32, i32) {
    %c1_i32 = arith.constant 1 : i32
    %0 = arith.muli %arg0, %c1_i32 : i32
    %1 = arith.addi %0, %arg2 : i32
    %c0_i32 = arith.constant 0 : i32
    %c0_i32_0 = arith.constant 0 : i32
    return %arg1, %c0_i32, %1 : i32, i32, i32
  }
  func.func @transform_1(%arg0: i32, %arg1: i32, %arg2: i32) -> (i32, i32, i32, i32) {
    %c0_i32 = arith.constant 0 : i32
    %c0_i32_0 = arith.constant 0 : i32
    %c0_i32_1 = arith.constant 0 : i32
    return %arg0, %arg1, %c0_i32, %c0_i32_0 : i32, i32, i32, i32
  }
  func.func @transform_2(%arg0: i32, %arg1: i32, %arg2: i32) -> (i32, i32, i32, i32) {
    %c0_i32 = arith.constant 0 : i32
    %c0_i32_0 = arith.constant 0 : i32
    %c0_i32_1 = arith.constant 0 : i32
    return %arg0, %arg1, %c0_i32, %c0_i32_0 : i32, i32, i32, i32
  }
  func.func @transform_3(%arg0: i32, %arg1: i32, %arg2: i32) -> (i32, i32, i32, i32) {
    %c0_i32 = arith.constant 0 : i32
    %c0_i32_0 = arith.constant 0 : i32
    %c0_i32_1 = arith.constant 0 : i32
    return %arg0, %arg1, %c0_i32, %c0_i32_0 : i32, i32, i32, i32
  }
}

</mosaic_0001>

<bundles_post_ra>
// kernel: tpu_custom_call.1
= control target key start
LH: loop header
LB: loop body
LE: loop exit
PB: predicated region body
PF: predicated region fallthrough
CT: control target
= control target key end

     0   :  { %9 = vsyncpa [#allocation4], 0  ;;  %s950_s0 = inlined_call_operand.hbm [shape: f32[2,4,256], index: 0, kind: input, shape index: {}]   ;;  %s951_s1 = inlined_call_operand.hbm [shape: f32[1,2,4,4], index: 1, kind: output, shape index: {0}]   ;;  %s952_s2 = inlined_call_operand.vmem [shape: f32[1,2,4,1], index: 2, kind: output, shape index: {1}]   ;;  %s953_s3 = inlined_call_operand.vmem [shape: f32[1,2,4,1], index: 3, kind: output, shape index: {2}]  }
   0x1   :  { %11 = vsyncpa [#allocation4 + $0x1], 0 }
   0x2   :  { %12 = vsyncpa [#allocation5], 0 }
   0x3   :  { %14 = vsyncpa [#allocation5 + $0x1], 0  ;;  %s798_s12 = smov 0   ;;  %s800_s13 = smov 0  }
   0x4   :  { %s802_s14 = smov 0   ;;  %s804_s15 = smov 0  }
   0x5   :  { %s806_s16 = smov 0   ;;  %s808_s17 = smov 0  }
   0x6 LB: > { %s578_s18 = sadd.s32 4294967295, %s773_s17   ;;  %s579_s19 = sadd.s32 4294967294, %s773_s17   ;;  %s773_s17 = sphi %s808_s17, %s20_s17   ;;  %s769_s16 = sphi %s806_s16, %s962_s16   ;;  %s765_s15 = sphi %s804_s15, %s961_s15   ;;  %s761_s14 = sphi %s802_s14, %s960_s14   ;;  %s757_s13 = sphi %s800_s13, %s959_s13   ;;  %s753_s12 = sphi %s798_s12, %s958_s12  }
   0x7   : > { %s35_s20 = sadd.s32 1, %s769_s16  ;;  %s50_s21 = sadd.s32 1, %s761_s14 }
   0x8   : > { %p37_p0 = scmp.ge.s32.totalorder %s35_s20, 2  ;;  %p57_p1 = scmp.ne.s32.totalorder %s761_s14, %s757_s13 }
   0x9   : > { %p58_p2 = scmp.eq.s32.totalorder %s773_s17, 0  ;;  %p63_p3 = scmp.ne.s32.totalorder %s757_s13, %s753_s12 }
   0xa   : > { %s964_s20 = smov (%p37_p0, %s35_s20), 0  ;;  %p64_p5 = scmp.eq.s32.totalorder %s578_s18, 0 }
   0xb   : > { %p839_p4 = por %p58_p2, %p57_p1  ;;  %s45_s23 = ssub.s32 %s769_s16, %s964_s20 }
   0xc   : > { %p89_p6 = scmp.eq.s32.totalorder %s578_s18, 1  ;;  %p48_p7 = scmp.eq.s32.totalorder %s45_s23, 0 }
   0xd   : > { %p845_p8 = por %p64_p5, %p63_p3  ;;  %p95_p10 = scmp.eq.s32.totalorder %s579_s19, 1 }
   0xe   : > { %p849_p9 = por %p89_p6, %p57_p1  ;;  %p581_p12 = scmp.ge.s32.totalorder %s773_s17, 2 }
   0xf   : > { %s854_s26 = scalar_select %p48_p7, %s761_s14, %s50_s21  }
  0x10   : > { %p856_p11 = por %p95_p10, %p63_p3  ;;  %p607_p13 = scmp.lt.s32.totalorder %s773_s17, 2 }
  0x11   : > { %s171_s28 = sand.u32 1, %s761_s14   ;;  %s594_s30 = sshll.u32 %s769_s16, 3 }
  0x12   : > { %s582_s29 = sshll.u32 %s171_s28, 3  ;;  %s183_s6 = scalar_lea.hbm %s950_s0, %s594_s30 }
  0x13   : > { %s175_s7 = scalar_lea.vmem [#allocation3], %s582_s29  ;;  %s185_s9 = sshll.u32 %s183_s6, 4  ;;  %s186_s9 = int_to_ptr.hbm [resolvable:$true] %s185_s9 }
  0x14   : > { %s187_s8 = sshll.u32 %s175_s7, 4  ;;  %p600_p0 = pnand %p607_p13, %p839_p4  ;;  %s188_s8 = int_to_ptr.vmem [resolvable:$true] %s187_s8 }
  0x15   : > { %p585_p1 = scmp.ge.s32.totalorder %s773_s17, 1  ;;  %p192_p2 = scmp.lt.s32.totalorder %s773_s17, 3 }
  0x16   : > { %s172_s10 = scalar_lea.sflag [#allocation4], %s171_s28 }
  0x17   : > { %602 = dma.hbm_to_vmem [thread:$0]  (!%p600_p0), %s186_s9, 128, %s188_s8, %s172_s10  }
  0x18   : > { %p193_p3 = pnand %p585_p1, %p192_p2 }
  0x19   : > { %s872_s11 = sand.u32 (!%p193_p3), 1, %s757_s13  }
  0x1a   : > { %196 = sbr.rel (%p193_p3) target bundleno = 445 (0x1bd), region = 24  ;;  %s586_s18 = sshll.u32 (!%p193_p3), %s872_s11, 3 }
  0x1b   : > { %s199_s19 = scalar_lea.sflag (!%p193_p3), [#allocation4], %s872_s11  ;;  %s202_s21 = scalar_lea.vmem (!%p193_p3), [#allocation3], %s586_s18 }
  0x1f   : > { %744 = dma.done.wait (%p845_p8), %s199_s19, 128  }
  0x20   : > { %746 = vsyncadd (%p845_p8), %s199_s19, 4294967168  ;;  %v260_v0 = vld [vmem:[%s202_s21] sm:$0xff]  ;;  %vm271_vm0 = vcmask 1043456   ;;  %v775_v6 = vmov 0   ;;  %vm278_vm1 = vcmask 3072   ;;  %p246_p4 = scmp.lt.s32.totalorder %s765_s15, 1 }
  0x21   : > { %266 = vst [vmem:[#allocation1] ss:$2 sm:$0xff] %v260_v0  ;;  %660 = vset.pattern.permute.xlu0 %v775_v6  ;;  %v776_v10 = vmov 839922192   ;;  %v777_v16 = vmov 0.0   ;;  %s587_s6 = sshll.u32 %s872_s11, 2 }
  0x22   : > { %v290_v11 = vunpack.c.l.s4 %v776_v10  ;;  %s247_s22 = scalar_select %p246_p4, %s765_s15, 1  ;;  %vm280_vm2 = vcmask 27648  }
  0x23   : > { %s221_s7 = scalar_lea.vmem [#allocation6], %s587_s6  ;;  %s591_s8 = sshll.u32 %s765_s15, 2 }
  0x24   : > { %v291_v12 = vunpack.c.0.s8 %v290_v11  ;;  %s588_s23 = sshll.u32 %s247_s22, 2  ;;  %281 = vst.msk [vmem:[%s221_s7] sm:$0xf] %vm280_vm2, %v777_v16  ;;  %s408_s18 = scalar_lea.hbm %s951_s1, %s591_s8 }
  0x25   : > { %s888_s29 = scalar_lea.vmem %s952_s2, %s588_s23  ;;  %s895_s5 = scalar_lea.vmem %s953_s3, %s588_s23 }
  0x26   : > { %282 = vst.msk [vmem:[%s888_s29] sm:$0xf] %vm278_vm1, %v777_v16  ;;  %s410_s19 = sshll.u32 %s221_s7, 4  ;;  %s412_s21 = sshll.u32 %s408_s18, 4  ;;  %s411_s19 = int_to_ptr.vmem [resolvable:$true] %s410_s19  ;;  %s413_s21 = int_to_ptr.hbm [resolvable:$true] %s412_s21 }
  0x27   : > { %283 = vst.msk [vmem:[%s895_s5] sm:$0xf] %vm278_vm1, %v777_v16  ;;  %s380_s15 = scalar_lea.sflag [#allocation5], %s872_s11  ;;  %s705_s22 = sshra.s32 %s413_s21, 4  ;;  %s706_s22 = int_to_ptr.hbm [resolvable:$true] %s705_s22 }
  0x28   : > { %v267_v1 = vld.sshfl [vmem:[#allocation1] sm:$0xff pattern:$0x75316420]  ;;  %v268_v2 = vld.sshfl [vmem:[#allocation1 + $0x8] sm:$0xff pattern:$0x75316420]  ;;  %p712_p8 = scmp.lt.s32.totalorder %s706_s22, %s951_s1 }
  0x29   : > { %v272_v3 = vsel %vm271_vm0, %v267_v1, 0.0  ;;  %v273_v4 = vsel %vm271_vm0, %v268_v2, 0.0  ;;  %s707_s23 = scalar_lea.hbm %s706_s22, 4 }
  0x2a   : > { %v274_v5 = vadd.f32 %v273_v4, %v272_v3  ;;  %p708_p5 = scmp.ne.s32.totalorder %s706_s22, %s707_s23 }
  0x2b   : > { %v346_v36 = vld [vmem:[%s221_s7] sm:$0xf] }
  0x2c   : > { %275 = vadd.xlane.f32.xlu0 %v274_v5  ;;  %p709_p6 = pnand %p708_p5, %p849_p9 }
  0x2d   : > { %v350_v31 = vld [vmem:[%s888_s29] sm:$0xf] }
  0x2e   : > { %v365_v39 = vld [vmem:[%s895_s5] sm:$0xf]  ;;  %p710_p7 = pneg %p709_p6 }
  0x9f   : > { %v276_v7 = vpop.xlane.xlu0 %275 }
  0xa0   : > { %v277_v8 = vmul.f32 0.00390625, %v276_v7 }
  0xa2   : > { %279 = vst.msk [vmem:[#allocation2] sm:$0xf] %vm278_vm1, %v277_v8 }
  0xa9   : > { %v284_v9 = vld [vmem:[#allocation2] sm:$0xf] }
  0xaa   : > { %287 = vperm.xlu0 %660, %v284_v9  }
 0x11c   : > { %v288_v13 = vpop.permute.xlu0 %287 }
 0x11d   : > { %v292_v14 = vperm.slane %v288_v13, %v291_v12 }
 0x11f   : > { %v294_v15 = vsub.f32 %v260_v0, %v292_v14 }
 0x121   : > { %296 = vst [vmem:[#allocation1] ss:$2 sm:$0xff] %v294_v15 }
 0x128   : > { %v297_v17 = vld.sshfl [vmem:[#allocation1] sm:$0xff pattern:$0x75316420]  ;;  %v298_v18 = vld.sshfl [vmem:[#allocation1 + $0x8] sm:$0xff pattern:$0x75316420] }
 0x129   : > { %301 = vst [vmem:[#allocation1] ss:$2 sm:$0xff] %v294_v15 }
 0x130   : > { %v302_v19 = vld.sshfl [vmem:[#allocation1] sm:$0xff pattern:$0x75316420]  ;;  %v303_v20 = vld.sshfl [vmem:[#allocation1 + $0x8] sm:$0xff pattern:$0x75316420] }
 0x131   : > { %321 = vmatpush.xpose.msra.mxu0 %v302_v19  ;;  %341 = vmatpush.xpose.msra.mxu1 %v303_v20  ;;  %351 = vst [vmem:[#allocation1] ss:$2 sm:$0xff] %v294_v15 }
 0x134   : > { %322 = vmatmul.f32.vlgmr.msra.gmra.mxu0 %v297_v17  ;;  %342 = vmatmul.f32.vlgmr.msra.gmra.mxu1 %v298_v18 }
 0x138   : > { %v352_v21 = vld.sshfl [vmem:[#allocation1] sm:$0xff pattern:$0x75316420]  ;;  %v353_v22 = vld.sshfl [vmem:[#allocation1 + $0x8] sm:$0xff pattern:$0x75316420] }
 0x139   : > { %v357_v23 = vsel %vm271_vm0, %v352_v21, 0.0  ;;  %v358_v24 = vsel %vm271_vm0, %v353_v22, 0.0  ;;  %367 = vst [vmem:[#allocation1] ss:$2 sm:$0xff] %v260_v0 }
 0x13a   : > { %v359_v25 = vadd.f32 %v358_v24, %v357_v23 }
 0x13c   : > { %360 = vadd.xlane.f32.xlu1 %v359_v25 }
 0x140   : > { %v368_v26 = vld.sshfl [vmem:[#allocation1] sm:$0xff pattern:$0x75316420]  ;;  %v369_v27 = vld.sshfl [vmem:[#allocation1 + $0x8] sm:$0xff pattern:$0x75316420] }
 0x141   : > { %v372_v28 = vsel %vm271_vm0, %v368_v26, 0.0  ;;  %v373_v29 = vsel %vm271_vm0, %v369_v27, 0.0 }
 0x142   : > { %v374_v30 = vadd.f32 %v373_v29, %v372_v28 }
 0x144   : > { %375 = vadd.xlane.f32.xlu1 %v374_v30 }
 0x1af   : > { %v361_v32 = vpop.xlane.xlu1 %360 }
 0x1b0   : > { %v362_v33 = vadd.f32 %v361_v32, %v350_v31 }
 0x1b1   : > { %v323_v34 = vpop.f32.mrf.mxu0  ;;  %v343_v35 = vpop.f32.mrf.mxu1 }
 0x1b2   : > { %364 = vst.msk [vmem:[%s888_s29] sm:$0xf] %vm278_vm1, %v362_v33  ;;  %v344_v37 = vadd.f32 %v343_v35, %v323_v34  ;;  %s711_s29 = scalar_lea.hbm %s951_s1, 8 }
 0x1b3   : > { %p713_p10 = scmp.lt.s32.totalorder %s711_s29, %s707_s23 }
 0x1b4   : > { %v347_v38 = vadd.f32 %v346_v36, %v344_v37 }
 0x1b5   : > { %p714_p13 = por %p713_p10, %p712_p8 }
 0x1b6   : > { %349 = vst.msk [vmem:[%s221_s7] sm:$0xf] %vm280_vm2, %v347_v38 }
 0x1b7   : > { %v376_v40 = vpop.xlane.xlu1 %375  ;;  %p715_p0 = pnand %p714_p13, %p710_p7 }
 0x1b9   : > { %718 = shalt.err (!%p715_p0)
}
 0x1ba   : > { %597 = dma.vmem_to_hbm [thread:$0]  (%p849_p9), %s411_s19, 64, %s413_s21, %s380_s15   ;;  %v377_v41 = vadd.f32 %v376_v40, %v365_v39 }
 0x1bc   : > { %378 = vst.msk [vmem:[%s895_s5] sm:$0xf] %vm278_vm1, %v377_v41 }
 0x1bd PF: > { %s430_s11 = sand.u32 1, %s753_s12   ;;  %p604_p1 = pnand %p581_p12, %p856_p11 }
 0x1be   : > { %s431_s6 = scalar_lea.sflag [#allocation5], %s430_s11 }
 0x1bf   : > { %p605_p2 = pneg %p604_p1 }
 0x1c1   : > { %748 = dma.done.wait (%p605_p2), %s431_s6, 64  }
 0x1c2   : > { %750 = vsyncadd (%p605_p2), %s431_s6, 4294967232  ;;  %s20_s17 = sadd.s32 1, %s773_s17   ;;  %s958_s12 = smov %s757_s13 }
 0x1c3   : > { %p17_p3 = scmp.ge.s32.totalorder %s20_s17, 4   ;;  %s959_s13 = smov %s761_s14 }
 0x1c4   : > { %s960_s14 = smov %s854_s26  ;;  %s961_s15 = smov %s769_s16 }
 0x1c5   : > { %s962_s16 = smov %s964_s20  ;;  %19 = sbr.rel (!%p17_p3) target bundleno = 6 (0x6), region = 97 }
 0x1ca   :  { %459 = vsyncpa [#allocation4], 1 }
 0x1cb   :  { %461 = vsyncpa [#allocation4 + $0x1], 1 }
 0x1cc   :  { %462 = vsyncpa [#allocation5], 1 }
 0x1cd   :  { %464 = vsyncpa [#allocation5 + $0x1], 1 }

</bundles_post_ra>
